<compile_context>
chip_gen: v6e
topology: v6e:2x2x1
jax: 0.10.0
libtpu: 0.0.40
codegen_flags: <defaults>
</compile_context>

<pallas_src>
import functools
import math

import jax
import jax.numpy as jnp
from jax.experimental import pallas as pl
from jax.experimental.pallas import tpu as pltpu


def _linear_ln_posenc_kernel(x_ref, w_ref, b_ref, gs_ref, pe_ref, o_ref, *, eps):
    # x_ref : (tT, idim)   native dtype (cast to bf16 in-kernel for the MXU)
    # w_ref : (idim, odim) bf16  -- resident weights
    # b_ref : (1, odim)    f32   -- Linear bias
    # gs_ref: (1, odim)    f32   -- gamma * sqrt(odim)
    # pe_ref: (tT, odim)   f32   -- pe + beta * sqrt(odim) (constant over batch)
    # o_ref : (tT, odim)
    x = x_ref[...].astype(jnp.bfloat16)                                # free VPU cast
    y = jnp.dot(x, w_ref[...], preferred_element_type=jnp.float32)     # MXU, f32 acc
    y = y + b_ref[...]                                                 # (1, odim) bcast
    # LayerNorm over the last dim (biased variance, matches torch.nn.LayerNorm).
    mean = jnp.mean(y, axis=-1, keepdims=True)
    yc = y - mean
    var = jnp.mean(yc * yc, axis=-1, keepdims=True)
    y_norm = yc * jax.lax.rsqrt(var + eps)
    # Fused LN-affine + positional-encoding epilogue: one multiply-add.
    o_ref[...] = (y_norm * gs_ref[...] + pe_ref[...]).astype(o_ref.dtype)


def _sinusoidal_pe(length, d_model, offset=0, dtype=jnp.float32):
    """Standard wenet/ESPnet sinusoidal positional encoding, shape (length, d_model)."""
    assert d_model % 2 == 0, "sinusoidal positional encoding expects an even odim"
    pos = jnp.arange(offset, offset + length, dtype=jnp.float32)[:, None]         # (T, 1)
    div_term = jnp.exp(
        jnp.arange(0, d_model, 2, dtype=jnp.float32) * -(math.log(10000.0) / d_model)
    )                                                                              # (d/2,)
    angles = pos * div_term[None, :]                                               # (T, d/2)
    pe = jnp.zeros((length, d_model), dtype=jnp.float32)
    pe = pe.at[:, 0::2].set(jnp.sin(angles))
    pe = pe.at[:, 1::2].set(jnp.cos(angles))
    return pe.astype(dtype)


def linear_no_subsampling(x, x_mask, params, offset=0, t_tile=512, out_dtype=None):
    """x: (B, T, idim); x_mask: (B, 1, T) bool. Returns (x_out, pos_emb, x_mask)."""
    B, T, idim = x.shape
    W = params["w"].astype(jnp.bfloat16)          # (idim, odim) -- bf16 for the MXU
    b = params["b"].astype(jnp.float32)           # (1, odim)
    gamma = params["gamma"].astype(jnp.float32)   # (1, odim)
    beta = params["beta"].astype(jnp.float32)     # (1, odim)
    odim = W.shape[1]
    xscale = math.sqrt(odim)
    if out_dtype is None:
        out_dtype = x.dtype                       # pass bf16 here to halve output traffic

    # --- T tiling (no padding / slicing: Pallas handles the ragged last tile) ---
    if T <= t_tile:
        tT = T                                    # single full-extent tile (always legal)
    else:
        tT = max(16, (t_tile // 16) * 16)         # multiple of 16: bf16-sublane friendly
    nT = pl.cdiv(T, tT)

    # Positional encoding; fuse beta*xscale and gamma*xscale into the operands
    # so the in-kernel epilogue is a single multiply-add.
    pe = _sinusoidal_pe(T, odim, offset=offset, dtype=jnp.float32)      # (T, odim)
    pe_fused = pe + beta * xscale                                       # (T, odim)
    gamma_s = gamma * xscale                                            # (1, odim)

    kernel = functools.partial(_linear_ln_posenc_kernel, eps=1e-5)

    x_bytes = jnp.dtype(x.dtype).itemsize
    o_bytes = jnp.dtype(out_dtype).itemsize
    bytes_accessed = (
        B * T * idim * x_bytes        # x read in its native dtype
        + idim * odim * 2             # W (bf16, resident)
        + T * odim * 4                # fused pe, read once per T-tile
        + B * T * odim * o_bytes      # output
        + 2 * odim * 4                # bias / gamma' (beta already fused into pe)
    )
    cost = pl.CostEstimate(
        flops=2 * B * T * idim * odim,
        transcendentals=B * T,        # one rsqrt per row
        bytes_accessed=bytes_accessed,
    )

    out = pl.pallas_call(
        kernel,
        out_shape=jax.ShapeDtypeStruct((B, T, odim), out_dtype),
        grid_spec=pltpu.PrefetchScalarGridSpec(
            num_scalar_prefetch=0,
            # T-tile axis OUTER, batch INNER: pe_fused's block index is constant
            # across the inner loop -> fetched once per T-tile, not once per batch.
            grid=(nT, B),
            in_specs=[
                pl.BlockSpec((None, tT, idim), lambda ti, bi: (bi, ti, 0)),  # x (B squeezed)
                pl.BlockSpec((idim, odim), lambda ti, bi: (0, 0)),           # W (resident)
                pl.BlockSpec((1, odim), lambda ti, bi: (0, 0)),              # bias
                pl.BlockSpec((1, odim), lambda ti, bi: (0, 0)),              # gamma*xscale
                pl.BlockSpec((tT, odim), lambda ti, bi: (ti, 0)),            # pe + beta*xscale
            ],
            out_specs=pl.BlockSpec((None, tT, odim), lambda ti, bi: (bi, ti, 0)),
        ),
        compiler_params=pltpu.CompilerParams(
            dimension_semantics=("parallel", "parallel"),
            vmem_limit_bytes=48 * 1024 * 1024,
        ),
        cost_estimate=cost,
    )(x, W, b, gamma_s, pe_fused)

    pos_emb = pe[None, :, :].astype(x.dtype)                            # (1, T, odim)
    return out, pos_emb, x_mask


def init_params(key, idim, odim):
    kw, kb = jax.random.split(key)
    bound = 1.0 / math.sqrt(idim)   # torch.nn.Linear default init range
    w = jax.random.uniform(kw, (idim, odim), jnp.float32, -bound, bound)
    b = jax.random.uniform(kb, (1, odim), jnp.float32, -bound, bound)
    gamma = jnp.ones((1, odim), jnp.float32)   # torch.nn.LayerNorm defaults
    beta = jnp.zeros((1, odim), jnp.float32)
    # Store the matmul weight in bf16 (MXU-native); LN params stay f32.
    return {"w": w.astype(jnp.bfloat16), "b": b, "gamma": gamma, "beta": beta}


def _reference(x, x_mask, params, offset=0):
    """Plain-JAX reference using the same bf16 matmul inputs as the kernel."""
    W = params["w"].astype(jnp.bfloat16)
    xb = x.astype(jnp.bfloat16)
    y = jnp.einsum("bti,io->bto", xb, W, preferred_element_type=jnp.float32)
    y = y + params["b"][None].astype(jnp.float32)
    mean = jnp.mean(y, axis=-1, keepdims=True)
    var = jnp.mean((y - mean) ** 2, axis=-1, keepdims=True)
    y = (y - mean) / jnp.sqrt(var + 1e-5)
    y = y * params["gamma"][None] + params["beta"][None]
    T, odim = x.shape[1], params["w"].shape[1]
    xscale = math.sqrt(odim)
    pe = _sinusoidal_pe(T, odim, offset=offset)
    y = y * xscale + pe[None]
    return y.astype(x.dtype), pe[None].astype(x.dtype), x_mask


if __name__ == "__main__":
    # Small shapes; t_tile=16 exercises multi-tile T (nT > 1) plus the ragged
    # (partial) last tile; the default t_tile exercises the single-tile path.
    B, T, idim, odim = 2, 20, 32, 64
    key = jax.random.PRNGKey(0)
    kx, kp = jax.random.split(key)
    x = jax.random.normal(kx, (B, T, idim), jnp.float32)
    x_mask = jnp.ones((B, 1, T), dtype=bool)
    params = init_params(kp, idim, odim)

    x_ref, pe_ref, _ = _reference(x, x_mask, params, offset=0)

    # Path 1: ragged multi-tile T (tT=16, last tile has only 4 valid rows).
    x_out, pos_emb, mask_out = linear_no_subsampling(
        x, x_mask, params, offset=0, t_tile=16)
    jax.block_until_ready(x_out)
    jax.block_until_ready(pos_emb)
    assert x_out.shape == (B, T, odim) and pos_emb.shape == (1, T, odim)
    assert jnp.allclose(x_out, x_ref, atol=2e-2, rtol=2e-2), "mismatch vs reference"
    assert jnp.allclose(pos_emb, pe_ref, atol=1e-6), "pos_emb mismatch"
    assert mask_out.shape == x_mask.shape

    # Path 2: default tile (single full-extent T tile).
    x_out2, pos_emb2, _ = linear_no_subsampling(x, x_mask, params, offset=0)
    jax.block_until_ready(x_out2)
    assert jnp.allclose(x_out2, x_ref, atol=2e-2, rtol=2e-2), "mismatch (single tile)"
    assert jnp.allclose(pos_emb2, pe_ref, atol=1e-6), "pos_emb mismatch (single tile)"

    print("KERNEL_OK")
</pallas_src>

<mosaic_0001>
module attributes {stable_mosaic.version = 11 : i64} {
  func.func @_linear_ln_posenc_kernel(%arg0: i32, %arg1: i32, %arg2: memref<1x16x32xf32, #tpu.memory_space<vmem>>, %arg3: memref<32x64xbf16, #tpu.memory_space<vmem>>, %arg4: memref<1x64xf32, #tpu.memory_space<vmem>>, %arg5: memref<1x64xf32, #tpu.memory_space<vmem>>, %arg6: memref<16x64xf32, #tpu.memory_space<vmem>>, %arg7: memref<1x16x64xf32, #tpu.memory_space<vmem>>) attributes {dimension_semantics = [#tpu.dimension_semantics<parallel>, #tpu.dimension_semantics<parallel>], iteration_bounds = array<i64: 2, 2>, scalar_prefetch = 0 : i64, scratch_operands = 0 : i64, tpu.core_type = #tpu.core_type<tc>, window_params = [{transform_indices = @transform_0, window_bounds = array<i64: 1, 16, 32>}, {pipeline_mode = #tpu.pipeline_mode<synchronous>, transform_indices = @transform_1, window_bounds = array<i64: 32, 64>}, {pipeline_mode = #tpu.pipeline_mode<synchronous>, transform_indices = @transform_2, window_bounds = array<i64: 1, 64>}, {pipeline_mode = #tpu.pipeline_mode<synchronous>, transform_indices = @transform_3, window_bounds = array<i64: 1, 64>}, {transform_indices = @transform_4, window_bounds = array<i64: 16, 64>}, {transform_indices = @transform_5, window_bounds = array<i64: 1, 16, 64>}]} {
    %c0 = arith.constant 0 : index
    %c0_0 = arith.constant 0 : index
    %c0_1 = arith.constant 0 : index
    %0 = vector.load %arg2[%c0, %c0_0, %c0_1] : memref<1x16x32xf32, #tpu.memory_space<vmem>>, vector<1x16x32xf32>
    %1 = vector.shape_cast %0 : vector<1x16x32xf32> to vector<16x32xf32>
    %2 = arith.truncf %1 : vector<16x32xf32> to vector<16x32xbf16>
    %c0_2 = arith.constant 0 : index
    %c0_3 = arith.constant 0 : index
    %3 = vector.load %arg3[%c0_2, %c0_3] : memref<32x64xbf16, #tpu.memory_space<vmem>>, vector<32x64xbf16>
    %cst = arith.constant dense<0.000000e+00> : vector<16x64xf32>
    %4 = tpu.matmul %2, %3, %cst {dimension_numbers = #tpu.dot_dimension_numbers<[1], [0], [0], [1], [0, 0, 1, 1], [], []>} : vector<16x32xbf16>, vector<32x64xbf16>, vector<16x64xf32> -> vector<16x64xf32>
    %c0_4 = arith.constant 0 : index
    %c0_5 = arith.constant 0 : index
    %5 = vector.load %arg4[%c0_4, %c0_5] : memref<1x64xf32, #tpu.memory_space<vmem>>, vector<1x64xf32>
    %6 = vector.broadcast %5 : vector<1x64xf32> to vector<16x64xf32>
    %7 = arith.addf %4, %6 : vector<16x64xf32>
    %cst_6 = arith.constant dense<0.000000e+00> : vector<16xf32>
    %8 = vector.multi_reduction <add>, %7, %cst_6 [1] : vector<16x64xf32> to vector<16xf32>
    %9 = vector.shape_cast %8 : vector<16xf32> to vector<16x1xf32>
    %cst_7 = arith.constant 6.400000e+01 : f32
    %10 = vector.broadcast %cst_7 : f32 to vector<16x1xf32>
    %11 = arith.divf %9, %10 : vector<16x1xf32>
    %12 = vector.broadcast %11 : vector<16x1xf32> to vector<16x64xf32>
    %13 = arith.subf %7, %12 : vector<16x64xf32>
    %14 = arith.mulf %13, %13 : vector<16x64xf32>
    %cst_8 = arith.constant dense<0.000000e+00> : vector<16xf32>
    %15 = vector.multi_reduction <add>, %14, %cst_8 [1] : vector<16x64xf32> to vector<16xf32>
    %16 = vector.shape_cast %15 : vector<16xf32> to vector<16x1xf32>
    %cst_9 = arith.constant 6.400000e+01 : f32
    %17 = vector.broadcast %cst_9 : f32 to vector<16x1xf32>
    %18 = arith.divf %16, %17 : vector<16x1xf32>
    %cst_10 = arith.constant 9.99999974E-6 : f32
    %19 = vector.broadcast %cst_10 : f32 to vector<16x1xf32>
    %20 = arith.addf %18, %19 : vector<16x1xf32>
    %21 = math.rsqrt %20 : vector<16x1xf32>
    %22 = vector.broadcast %21 : vector<16x1xf32> to vector<16x64xf32>
    %23 = arith.mulf %13, %22 : vector<16x64xf32>
    %c0_11 = arith.constant 0 : index
    %c0_12 = arith.constant 0 : index
    %24 = vector.load %arg5[%c0_11, %c0_12] : memref<1x64xf32, #tpu.memory_space<vmem>>, vector<1x64xf32>
    %25 = vector.broadcast %24 : vector<1x64xf32> to vector<16x64xf32>
    %26 = arith.mulf %23, %25 : vector<16x64xf32>
    %c0_13 = arith.constant 0 : index
    %c0_14 = arith.constant 0 : index
    %27 = vector.load %arg6[%c0_13, %c0_14] : memref<16x64xf32, #tpu.memory_space<vmem>>, vector<16x64xf32>
    %28 = arith.addf %26, %27 : vector<16x64xf32>
    %c0_15 = arith.constant 0 : index
    %c0_16 = arith.constant 0 : index
    %c0_17 = arith.constant 0 : index
    %29 = vector.load %arg7[%c0_15, %c0_16, %c0_17] : memref<1x16x64xf32, #tpu.memory_space<vmem>>, vector<1x16x64xf32>
    %30 = vector.shape_cast %29 : vector<1x16x64xf32> to vector<16x64xf32>
    %31 = vector.shape_cast %28 : vector<16x64xf32> to vector<1x16x64xf32>
    tpu.vector_store %arg7[%c0_15, %c0_16, %c0_17], %31 {strides = array<i32>} : memref<1x16x64xf32, #tpu.memory_space<vmem>>, vector<1x16x64xf32>,
    return
  }
  func.func @transform_0(%arg0: i32, %arg1: i32) -> (i32, i32, i32) {
    %c0_i32 = arith.constant 0 : i32
    %c0_i32_0 = arith.constant 0 : i32
    return %arg1, %arg0, %c0_i32 : i32, i32, i32
  }
  func.func @transform_1(%arg0: i32, %arg1: i32) -> (i32, i32) {
    %c0_i32 = arith.constant 0 : i32
    %c0_i32_0 = arith.constant 0 : i32
    %c0_i32_1 = arith.constant 0 : i32
    return %c0_i32, %c0_i32_0 : i32, i32
  }
  func.func @transform_2(%arg0: i32, %arg1: i32) -> (i32, i32) {
    %c0_i32 = arith.constant 0 : i32
    %c0_i32_0 = arith.constant 0 : i32
    %c0_i32_1 = arith.constant 0 : i32
    return %c0_i32, %c0_i32_0 : i32, i32
  }
  func.func @transform_3(%arg0: i32, %arg1: i32) -> (i32, i32) {
    %c0_i32 = arith.constant 0 : i32
    %c0_i32_0 = arith.constant 0 : i32
    %c0_i32_1 = arith.constant 0 : i32
    return %c0_i32, %c0_i32_0 : i32, i32
  }
  func.func @transform_4(%arg0: i32, %arg1: i32) -> (i32, i32) {
    %c0_i32 = arith.constant 0 : i32
    %c0_i32_0 = arith.constant 0 : i32
    return %arg0, %c0_i32 : i32, i32
  }
  func.func @transform_5(%arg0: i32, %arg1: i32) -> (i32, i32, i32) {
    %c0_i32 = arith.constant 0 : i32
    %c0_i32_0 = arith.constant 0 : i32
    return %arg1, %arg0, %c0_i32 : i32, i32, i32
  }
}

</mosaic_0001>

<bundles_post_ra>
// kernel: tpu_custom_call.1
= control target key start
LH: loop header
LB: loop body
LE: loop exit
PB: predicated region body
PF: predicated region fallthrough
CT: control target
= control target key end

     0   :  { %s1012_s18 = smov 0   ;;  %s1014_s19 = smov 0   ;;  %s1164_s0 = inlined_call_operand.vmem [shape: f32[2,20,32], index: 0, kind: input, shape index: {}]   ;;  %s1165_s1 = inlined_call_operand.vmem [shape: bf16[32,64], index: 1, kind: input, shape index: {}]   ;;  %s1166_s2 = inlined_call_operand.vmem [shape: f32[1,64], index: 2, kind: input, shape index: {}]   ;;  %s1167_s3 = inlined_call_operand.vmem [shape: f32[1,64], index: 3, kind: input, shape index: {}]   ;;  %s1168_s4 = inlined_call_operand.vmem [shape: f32[20,64], index: 4, kind: input, shape index: {}]   ;;  %s1169_s5 = inlined_call_operand.vmem [shape: f32[2,20,64], index: 5, kind: output, shape index: {}]  }
   0x1   :  { %s1016_s20 = smov 0   ;;  %s1018_s21 = smov 0  }
   0x2   :  { %s1020_s22 = smov 0   ;;  %s1022_s23 = smov 0  }
   0x3   :  { %s1024_s24 = smov 0  }
   0x4 LB: > { %s24_s25 = sadd.s32 1, %s938_s22  ;;  %s27_s26 = sadd.s32 1, %s942_s23  ;;  %s946_s24 = sphi %s1024_s24, %s15_s24   ;;  %s942_s23 = sphi %s1022_s23, %s1176_s23   ;;  %s938_s22 = sphi %s1020_s22, %s1175_s22   ;;  %s934_s21 = sphi %s1018_s21, %s1174_s21   ;;  %s930_s20 = sphi %s1016_s20, %s1173_s20   ;;  %s926_s19 = sphi %s1014_s19, %s1172_s19   ;;  %s922_s18 = sphi %s1012_s18, %s1171_s18  }
   0x5   : > { %p25_p0 = scmp.ge.s32.totalorder %s24_s25, 2  ;;  %s685_s27 = sadd.s32 4294967295, %s946_s24  }
   0x6   : > { %p163_p1 = scmp.ne.s32.totalorder %s926_s19, %s922_s18  ;;  %p164_p2 = scmp.eq.s32.totalorder %s685_s27, 3 }
   0x7   : > { %s1178_s25 = smov (%p25_p0, %s24_s25), 0  ;;  %s1180_s26 = smov (!%p25_p0, %s27_s26), %s942_s23 }
   0x8   : > { %s148_s28 = ssub.s32 %s938_s22, %s1178_s25  ;;  %p29_p3 = scmp.ge.s32.totalorder %s1180_s26, 2 }
   0x9   : > { %p689_p4 = scmp.ge.s32.totalorder %s946_s24, 1  ;;  %p1058_p5 = por %p164_p2, %p163_p1 }
   0xa   : > { %p235_p6 = scmp.lt.s32.totalorder %s946_s24, 5  ;;  %s1182_s26 = smov (%p29_p3, %s1180_s26), 0 }
   0xb   : > { %s149_s30 = ssub.s32 %s942_s23, %s1182_s26  ;;  %s153_s7 = sadd.s32 1, %s926_s19 }
   0xc   : > { %p236_p7 = pnand %p689_p4, %p235_p6  ;;  %s150_s6 = sor.u32 %s149_s30, %s148_s28 }
   0xd   : > { %p151_p8 = scmp.eq.s32.totalorder %s150_s6, 0  ;;  %s1078_s13 = sshll.u32 (!%p236_p7), %s934_s21, 1 }
   0xe   : > { %239 = sbr.rel (%p236_p7) target bundleno = 576 (0x240), region = 40  ;;  %p284_p9 = scmp.lt.s32.totalorder (!%p236_p7), %s930_s20, 1 }
   0xf   : > { %s1069_s8 = scalar_select %p151_p8, %s926_s19, %s153_s7  }
  0x10   : > { %p286_p10 = scmp.lt.s32.totalorder (!%p236_p7), %s1078_s13, 2  ;;  %s276_s10 = sand.u32 (!%p236_p7), 1, %s922_s18  }
  0x13   : > { %v854_v0 = vld [vmem:[%s1165_s1 + $0x8] sm:$0xff]   ;;  %v980_v1 = vmov 0.0   ;;  %v855_v2 = vld [vmem:[%s1165_s1] sm:$0xff]   ;;  %vm981_vm0 = vmmov 0   ;;  %s285_s14 = scalar_select %p284_p9, %s930_s20, 1  ;;  %vm343_vm1 = vcmask 261120  }
  0x14   : > { %722 = vmatprep.subr.bf16.mxu0 %v980_v1  ;;  %726 = vmatprep.mubr.msk.bf16.mxu0 %vm981_vm0, %v980_v1  ;;  %s1084_s15 = scalar_select %p286_p10, %s1078_s13, 2  ;;  %v695_v6 = vld [vmem:[%s1166_s2] ss:$0 sm:$0xff]  ;;  %vm388_vm2 = vcmask 523264  }
  0x15   : > { %723 = vmatpush3.bf16.msra.mxu0 %v854_v0  ;;  %s730_s16 = smul.u32 3, %s285_s14  ;;  %v699_v32 = vld [vmem:[%s1167_s3] ss:$0 sm:$0xff]  ;;  %s439_s18 = ssub.s32 (%p1058_p5), 3, %s1078_s13 }
  0x16   : > { %724 = vmatprep.subr.bf16.mxu0 %v980_v1  ;;  %s694_s9 = sshll.u32 %s1084_s15, 3  ;;  %p440_p11 = scmp.lt.s32.totalorder (%p1058_p5), %s439_s18, 2 }
  0x17   : > { %s289_s17 = sadd.s32 %s730_s16, %s1084_s15  ;;  %s305_s14 = scalar_lea.vmem %s1168_s4, %s694_s9 }
  0x18   : > { %s692_s27 = sshll.u32 %s289_s17, 3  ;;  %v425_v34 = vld [vmem:[%s305_s14] sm:$0xff]  ;;  %v426_v39 = vld [vmem:[%s305_s14 + $0x8] sm:$0xff]  ;;  %s731_s15 = smul.u32 (%p1058_p5), 3, %s930_s20 }
  0x19   : > { %725 = vmatpush3.bf16.msra.mxu0 %v855_v2  ;;  %s291_s6 = scalar_lea.vmem %s1164_s0, %s692_s27  ;;  %s690_s27 = sshll.u32 %s276_s10, 4 }
  0x1a   : > { %v317_v3 = vld [vmem:[%s291_s6] sm:$0xff]  ;;  %v318_v4 = vld [vmem:[%s291_s6 + $0x8] sm:$0xff]  ;;  %s1105_s28 = scalar_lea.vmem [#allocation2], %s690_s27   ;;  %s445_s30 = sadd.s32 (%p1058_p5), %s731_s15, %s1078_s13 }
  0x1b   : > { %v319_v5 = vpack.c.bf16 %v318_v4, %v317_v3  ;;  %s704_s6 = sshll.u32 (%p1058_p5), %s445_s30, 3 }
  0x1c   : > { %s1122_s10 = scalar_lea.vmem (%p1058_p5), %s1169_s5, %s704_s6  }
  0x1d   : > { %727 = vmatmul.mubr.msk.bf16.vlgmr.msra.gmra.mxu0 %vm343_vm1, %v319_v5 }
  0xdd   : > { %v381_v7 = vpop.f32.mrf.mxu0 }
  0xde   : > { %v382_v8 = vadd.f32 %v695_v6, %v381_v7 }
  0xdf   : > { %v728_v9 = vpop.f32.mrf.mxu0 }
  0xe0   : > { %v389_v10 = vsel %vm388_vm2, %v382_v8, 0.0 }
  0xe1   : > { %390 = vadd.xlane.f32.xlu0 %v389_v10  ;;  %v384_v11 = vpop.f32.mrf.mxu0 }
  0xe2   : > { %v385_v12 = vadd.f32 %v695_v6, %v384_v11 }
  0xe3   : > { %v729_v13 = vpop.f32.mrf.mxu0 }
  0xe4   : > { %v392_v14 = vsel %vm388_vm2, %v385_v12, 0.0 }
  0xe5   : > { %393 = vadd.xlane.f32.xlu0 %v392_v14 }
 0x16a   : > { %v391_v15 = vpop.xlane.xlu0 %390 }
 0x16b   : > { %v396_v16 = vmul.f32 0.015625, %v391_v15 }
 0x16d   : > { %v398_v17 = vsub.f32 %v382_v8, %v396_v16 }
 0x16e   : > { %v394_v18 = vpop.xlane.xlu0 %393 }
 0x16f   : > { %v397_v19 = vmul.f32 0.015625, %v394_v18  ;;  %v400_v20 = vmul.f32 %v398_v17, %v398_v17 }
 0x171   : > { %v399_v21 = vsub.f32 %v385_v12, %v397_v19  ;;  %v402_v22 = vsel %vm388_vm2, %v400_v20, 0.0 }
 0x172   : > { %403 = vadd.xlane.f32.xlu1 %v402_v22 }
 0x173   : > { %v401_v23 = vmul.f32 %v399_v21, %v399_v21 }
 0x175   : > { %v405_v24 = vsel %vm388_vm2, %v401_v23, 0.0 }
 0x176   : > { %406 = vadd.xlane.f32.xlu1 %v405_v24 }
 0x1fb   : > { %v404_v25 = vpop.xlane.xlu1 %403 }
 0x1fc   : > { %v408_v26 = vmul.f32 0.015625, %v404_v25 }
 0x1fe   : > { %v410_v27 = vadd.f32 1e-05, %v408_v26 }
 0x1ff   : > { %v407_v28 = vpop.xlane.xlu1 %406 }
 0x200   : > { %856 = vrsqrt.f32 %v410_v27  ;;  %v409_v29 = vmul.f32 0.015625, %v407_v28 }
 0x202   : > { %v411_v30 = vadd.f32 1e-05, %v409_v29 }
 0x204   : > { %858 = vrsqrt.f32 %v411_v30 }
 0x20d   : > { %v857_v31 = vpop.eup %856 }
 0x20e   : > { %v414_v33 = vmul.f32 %v857_v31, %v398_v17 }
 0x210   : > { %v423_v35 = vmul.f32 %v699_v32, %v414_v33 }
 0x211   : > { %v859_v36 = vpop.eup %858 }
 0x212   : > { %v427_v37 = vadd.f32 %v425_v34, %v423_v35  ;;  %v415_v38 = vmul.f32 %v859_v36, %v399_v21 }
 0x214   : > { %429 = vst.msk [vmem:[%s1105_s28] sm:$0xff] %vm388_vm2, %v427_v37  ;;  %v424_v40 = vmul.f32 %v699_v32, %v415_v38  ;;  %437 = sbr.rel (!%p1058_p5) target bundleno = 576 (0x240), region = 44 }
 0x216   : > { %v428_v41 = vadd.f32 %v426_v39, %v424_v40 }
 0x218   : > { %430 = vst.msk [vmem:[%s1105_s28 + $0x8] sm:$0xff] %vm388_vm2, %v428_v41 }
 0x219   : > { %s1184_s18 = smov (!%p440_p11, %s439_s18), 2 }
 0x21a   : > { %s702_s21 = sshll.u32 %s1184_s18, 7 }
 0x21b   : > { %p705_p12 = scmp.eq.s32.totalorder %s702_s21, 0 }
 0x21c   : > { %s1125_s29 = sshrl.u32 (!%p705_p12), %s1184_s18, 1 }
 0x21d   : > { %450 = sbr.rel (%p705_p12) target bundleno = 576 (0x240), region = 48  ;;  %p706_p13 = scmp.le.s32.totalorder (!%p705_p12), %s1125_s29, 0 }
 0x222   : > { %624 = sbr.rel (%p706_p13) target bundleno = 559 (0x22f), region = 127  ;;  %s948_s20 = smov (!%p706_p13), %s1122_s10  }
 0x223   : > { %s952_s13 = smov (!%p706_p13), %s1105_s28   ;;  %s956_s11 = smov (!%p706_p13), 0  }
 0x224   : > { %s960_s12 = smov (!%p706_p13), 0  }
 0x227 LB: >> { %v515_v42 = vld [vmem:[%s954_s13] sm:$0xff]  ;;  %v517_v43 = vld [vmem:[%s954_s13 + $0x8] sm:$0xff]  ;;  %s519_s14 = sadd.s32 1, %s958_s11  ;;  %s509_s12 = sadd.s32 1, %s962_s12   ;;  %s962_s12 = sphi %s960_s12, %s509_s12   ;;  %s958_s11 = sphi %s956_s11, %s957_s11   ;;  %s954_s13 = sphi %s952_s13, %s524_s13   ;;  %s950_s20 = sphi %s948_s20, %s525_s20  }
 0x228   : >> { %516 = vst [vmem:[%s950_s20] sm:$0xff] %v515_v42  ;;  %518 = vst [vmem:[%s950_s20 + $0x8] sm:$0xff] %v517_v43  ;;  %p520_p0 = scmp.ge.s32.totalorder %s519_s14, %s1125_s29  ;;  %p508_p1 = scmp.ge.s32.totalorder %s509_s12, %s1125_s29 }
 0x22a   : >> { %s1186_s14 = smov (%p520_p0, %s519_s14), 0  ;;  %511 = sbr.rel (!%p508_p1) target bundleno = 551 (0x227), region = 133 }
 0x22b   : >> { %s707_s16 = sshll.u32 %s1186_s14, 4  ;;  %s957_s11 = smov %s1186_s14  }
 0x22c   : >> { %s524_s13 = scalar_lea.vmem %s1105_s28, %s707_s16 [#allocation2]   ;;  %s525_s20 = scalar_lea.vmem %s1122_s10, %s707_s16  }
 0x22f PF: > { %s1135_s17 = sand.u32 1, %s1184_s18   ;;  %s717_s27 = sshll.u32 %s1125_s29, 4 }
 0x230   : > { %s530_s15 = scalar_lea.vmem %s1105_s28, %s717_s27 [#allocation2]   ;;  %s532_s30 = scalar_lea.vmem %s1122_s10, %s717_s27  }
 0x231   : > { %p712_p2 = scmp.le.s32.totalorder %s1135_s17, 0 }
 0x232   : > { %s964_s6 = smov (!%p712_p2), %s532_s30   ;;  %s968_s21 = smov (!%p712_p2), %s530_s15  }
 0x233   : > { %638 = sbr.rel (%p712_p2) target bundleno = 576 (0x240), region = 138  ;;  %s972_s7 = smov (!%p712_p2), 0  }
 0x234   : > { %s976_s9 = smov (!%p712_p2), 0  }
 0x238 LB: >> { %v542_v44 = vld [vmem:[%s970_s21] sm:$0xff]  ;;  %s544_s18 = sadd.s32 1, %s974_s7  ;;  %s536_s9 = sadd.s32 1, %s978_s9   ;;  %s978_s9 = sphi %s976_s9, %s536_s9   ;;  %s974_s7 = sphi %s972_s7, %s973_s7   ;;  %s970_s21 = sphi %s968_s21, %s549_s21   ;;  %s966_s6 = sphi %s964_s6, %s550_s6  }
 0x239   : >> { %543 = vst [vmem:[%s966_s6] sm:$0xff] %v542_v44  ;;  %p545_p3 = scmp.ge.s32.totalorder %s544_s18, %s1135_s17  ;;  %p535_p4 = scmp.ge.s32.totalorder %s536_s9, %s1135_s17 }
 0x23b   : >> { %s1188_s18 = smov (%p545_p3, %s544_s18), 0  ;;  %538 = sbr.rel (!%p535_p4) target bundleno = 568 (0x238), region = 144 }
 0x23c   : >> { %s713_s28 = sshll.u32 %s1188_s18, 3  ;;  %s973_s7 = smov %s1188_s18  }
 0x23d   : >> { %s549_s21 = scalar_lea.vmem %s530_s15, %s713_s28 [#allocation2]   ;;  %s550_s6 = scalar_lea.vmem %s532_s30, %s713_s28  }
 0x240 PF: > { %s15_s24 = sadd.s32 1, %s946_s24   ;;  %s1171_s18 = smov %s926_s19 }
 0x241   : > { %p12_p5 = scmp.ge.s32.totalorder %s15_s24, 6   ;;  %s1172_s19 = smov %s1069_s8 }
 0x242   : > { %s1173_s20 = smov %s938_s22  ;;  %s1174_s21 = smov %s942_s23 }
 0x243   : > { %s1175_s22 = smov %s1178_s25  ;;  %s1176_s23 = smov %s1182_s26 }
 0x244   :  { %14 = sbr.rel (!%p12_p5) target bundleno = 4 (0x4), region = 155 }

</bundles_post_ra>
